<compile_context>
chip_gen: v7x
topology: tpu7x:2x2x1
jax: 0.10.0
libtpu: 0.0.40
codegen_flags: <defaults>
</compile_context>

<pallas_src>
import functools

import jax
import jax.numpy as jnp
from jax.experimental import pallas as pl
from jax.experimental.pallas import tpu as pltpu


def _round_up(x, m):
    return ((x + m - 1) // m) * m


# ----------------------------------------------------------------------------
# VMEM budget (per-generation): ~3/4 of physical, capped at 96 MiB.
# ----------------------------------------------------------------------------
def _query_vmem_capacity():
    try:
        info_fn = getattr(pltpu, "get_tpu_info", None)
        if info_fn is None:
            return 64 * 1024 * 1024
        cap = getattr(info_fn(), "vmem_capacity_bytes", None)
        if not cap:
            return 64 * 1024 * 1024
        return int(cap)
    except Exception:
        return 64 * 1024 * 1024


_PHYS_VMEM = _query_vmem_capacity()
_VMEM_LIMIT = max(32 * 1024 * 1024, min((_PHYS_VMEM * 3) // 4, 96 * 1024 * 1024))


def _pick_hw_tile(tn, c, vmem_limit):
    """Largest lane tile such that f double-buffer + ~3 (TN,T) f32 temps + grid rows
    fit in ~60% of the scoped VMEM budget."""
    budget = int(vmem_limit * 0.6)
    per_lane = 2 * c * 2 + 3 * tn * 4 + 32   # f (bf16, x2 buf) + score temps + grid/norm rows
    t = budget // per_lane
    t = max(2048, min(32768, (t // 2048) * 2048))
    return t


# ----------------------------------------------------------------------------
# ImageNet normalization folded into conv1 (exact).
# ----------------------------------------------------------------------------
_IMAGENET_MEAN = jnp.array([0.485, 0.456, 0.406], jnp.float32)
_IMAGENET_STD = jnp.array([0.229, 0.224, 0.225], jnp.float32)


def _fold_imagenet_norm(w1, b1, cin=3):
    """conv(norm(x), w1, b1) == conv(x padded with mean, w1', b1') with
    w1'[tap,c,:] = w1[tap,c,:]/sigma_c and b1' = b1 - sum_taps,c (mu_c/sigma_c) w1."""
    inv_std = 1.0 / _IMAGENET_STD
    taps = w1.shape[0] // cin
    w = w1.reshape(taps, cin, -1)
    w_f = w * inv_std[None, :, None]
    b_f = b1 - jnp.sum(w * (_IMAGENET_MEAN * inv_std)[None, :, None], axis=(0, 1))
    return w_f.reshape(taps * cin, -1), b_f, _IMAGENET_MEAN


# ----------------------------------------------------------------------------
# Kernel 1: M-tiled matmul + bias (+ ReLU) — used for the im2col conv layers
# ----------------------------------------------------------------------------
def _matmul_bias_kernel(x_ref, w_ref, b_ref, o_ref, *, relu):
    y = jnp.dot(x_ref[...], w_ref[...], preferred_element_type=jnp.float32)
    y = y + b_ref[...]
    if relu:
        y = jnp.maximum(y, 0.0)
    o_ref[...] = y.astype(o_ref.dtype)


def pallas_linear(x, w, b, relu=False, out_dtype=jnp.bfloat16, tm=1024):
    """x: [M, K], w: [K, N], b: [N] -> [M, N].  M tiled (parallel grid axis),
    K padded to a lane multiple, bf16 operands with f32 MXU accumulation."""
    M, K = x.shape
    N = w.shape[1]
    Kp = _round_up(K, 128)
    TM = min(tm, _round_up(M, 8))
    Mp = _round_up(M, TM)
    xp = jnp.pad(x.astype(jnp.bfloat16), ((0, Mp - M), (0, Kp - K)))
    wp = jnp.pad(w.astype(jnp.bfloat16), ((0, Kp - K), (0, 0)))
    bp = b.reshape(1, N).astype(jnp.float32)
    out = pl.pallas_call(
        functools.partial(_matmul_bias_kernel, relu=relu),
        out_shape=jax.ShapeDtypeStruct((Mp, N), out_dtype),
        grid=(Mp // TM,),
        in_specs=[
            pl.BlockSpec((TM, Kp), lambda i: (i, 0)),
            pl.BlockSpec((Kp, N), lambda i: (0, 0)),
            pl.BlockSpec((1, N), lambda i: (0, 0)),
        ],
        out_specs=pl.BlockSpec((TM, N), lambda i: (i, 0)),
        compiler_params=pltpu.CompilerParams(
            dimension_semantics=("parallel",),
            vmem_limit_bytes=_VMEM_LIMIT),
    )(xp, wp, bp)
    return out[:M]


def conv2d_pallas(x, w, b, *, k, stride, pad, relu=False, pad_value=None):
    """Conv via im2col (JAX glue) + tiled Pallas matmul.

    x: [B, Cin, H, W];  w: [k*k*Cin, Cout];  b: [Cout]  ->  NHWC [B, Ho, Wo, Cout] bf16
    pad_value: optional per-channel constant used for spatial padding (conv1 fold).
    """
    B, Cin, H, W = x.shape
    Ho = (H + 2 * pad - k) // stride + 1
    Wo = (W + 2 * pad - k) // stride + 1
    if pad_value is None:
        xp = jnp.pad(x, ((0, 0), (0, 0), (pad, pad), (pad, pad)))
    else:
        pv = pad_value.reshape(1, -1, 1, 1).astype(x.dtype)
        xp = jnp.pad(x - pv, ((0, 0), (0, 0), (pad, pad), (pad, pad))) + pv
    cols = []
    for di in range(k):
        for dj in range(k):
            cols.append(
                xp[:, :, di:di + stride * (Ho - 1) + 1:stride,
                         dj:dj + stride * (Wo - 1) + 1:stride]
            )
    patches = jnp.concatenate(cols, axis=1)                     # [B, k*k*Cin, Ho, Wo]
    patches = patches.transpose(0, 2, 3, 1).reshape(B * Ho * Wo, k * k * Cin)
    y = pallas_linear(patches, w, b, relu=relu)                 # [B*Ho*Wo, Cout] bf16
    return y.reshape(B, Ho, Wo, -1)


# ----------------------------------------------------------------------------
# Kernel 2 (hot path): correlation + windowed online-softmax + expected 2D coord
# ----------------------------------------------------------------------------
def _corr_expect_kernel(hit_ref, fidx_ref, q_ref, f_ref, fn_ref, g_ref, ctr_ref, o_ref,
                        m_sc, l_sc, ex_sc, ey_sc, *, win, windowed, n_tiles):
    b = pl.program_id(0)
    n = pl.program_id(1)
    t = pl.program_id(2)
    del fidx_ref  # consumed by the index_maps (DMA skip), not by the body

    @pl.when(t == 0)
    def _init():
        m_sc[...] = jnp.full_like(m_sc, -1e30)
        l_sc[...] = jnp.zeros_like(l_sc)
        ex_sc[...] = jnp.zeros_like(ex_sc)
        ey_sc[...] = jnp.zeros_like(ey_sc)

    def _compute():
        g = g_ref[0]                         # (3, T) f32: [gx; gy; valid]
        gx = g[0:1, :]
        gy = g[1:2, :]
        valid = g[2:3, :] > 0.5

        # q is pre-normalized (scale * q/||q||, bf16); f inverse norm is precomputed.
        qn = q_ref[0]                        # (TN, C) bf16
        f = f_ref[0]                         # (C, T)  bf16
        inv_fn = fn_ref[0]                   # (1, T)  f32

        # Correlation on the MXU: (TN, C) x (C, T) -> (TN, T), f32 accumulation.
        s = jnp.dot(qn, f, preferred_element_type=jnp.float32) * inv_fn

        if windowed:
            ctr = ctr_ref[0]                 # (TN, 2)
            cx = ctr[:, 0:1]
            cy = ctr[:, 1:2]
            mask = valid & (jnp.abs(gx - cx) <= win) & (jnp.abs(gy - cy) <= win)
        else:
            mask = valid                     # (1, T), broadcasts against (TN, T)

        # Online softmax update (mask fused into exp: no -1e30 fill pass).
        m_tile = jnp.max(jnp.where(mask, s, -1e30), axis=-1, keepdims=True)   # (TN, 1)
        m_new = jnp.maximum(m_sc[...], m_tile)
        alpha = jnp.exp(m_sc[...] - m_new)
        p = jnp.where(mask, jnp.exp(s - m_new), 0.0)                          # (TN, T)
        l_sc[...] = alpha * l_sc[...] + jnp.sum(p, axis=-1, keepdims=True)
        ex_sc[...] = alpha * ex_sc[...] + jnp.sum(p * gx, axis=-1, keepdims=True)
        ey_sc[...] = alpha * ey_sc[...] + jnp.sum(p * gy, axis=-1, keepdims=True)
        m_sc[...] = m_new

    if windowed:
        # Tile-skip gate (compute only; the DMA skip lives in the index_maps).
        pl.when(hit_ref[b * n_tiles + n, t] > 0)(_compute)
    else:
        _compute()

    @pl.when(t == pl.num_programs(2) - 1)
    def _fin():
        # Note: if a query's window misses every valid position, l == 0 and the
        # result degenerates (epsilon-guarded) instead of erroring.
        inv_l = pl.reciprocal(l_sc[...] + 1e-30, approx=True)
        o_ref[0] = jnp.concatenate([ex_sc[...] * inv_l, ey_sc[...] * inv_l], axis=-1)


def correlate_expect(q, f_t, ctr, *, Wf, stride, offset, win, scale=10.0,
                     windowed=False, hw_tile=None):
    """q: [B, N, C] (bf16), f_t: [B, C, HW] (bf16, pre-transposed), ctr: [B, N, 2] f32
    -> expected coords [B, N, 2] f32."""
    B, N, C = q.shape
    HW = f_t.shape[2]

    # Hoisted query normalization: qn = scale * q / ||q||  (once per call, in JAX).
    q32 = q.astype(jnp.float32)
    qn = q32 * (scale * jax.lax.rsqrt(jnp.sum(q32 * q32, axis=-1, keepdims=True) + 1e-8))

    # N (query) tiling: TN <= 256, pad N up.  Padded queries are sliced off at the end.
    TN = min(_round_up(N, 8), 256)
    Np = _round_up(N, TN)
    n_tiles = Np // TN
    qn = jnp.pad(qn, ((0, 0), (0, Np - N), (0, 0))).astype(jnp.bfloat16)
    ctr_pad = -1e9 if windowed else 0.0      # padded queries never hit any tile
    ctr_p = jnp.pad(ctr.astype(jnp.float32), ((0, 0), (0, Np - N), (0, 0)),
                    constant_values=ctr_pad)

    # HW tiling: derived from the chip VMEM budget.
    if hw_tile is None:
        hw_tile = _pick_hw_tile(TN, C, _VMEM_LIMIT)
    if HW <= hw_tile:
        T, HWp = HW, HW
    else:
        T = hw_tile                                   # multiple of 128
        HWp = _round_up(HW, T)
    num_t = HWp // T

    # Precomputed coordinate grid + validity row (shared across batch, tiled on lanes).
    pos = jnp.arange(HWp, dtype=jnp.int32)
    gx = (pos % Wf).astype(jnp.float32) * stride + offset
    gy = (pos // Wf).astype(jnp.float32) * stride + offset
    valid = (pos < HW).astype(jnp.float32)
    grid_arr = jnp.stack([gx, gy, valid], axis=0)[None]          # [1, 3, HWp] f32

    # Precomputed per-position inverse feature norm (f32 row; exact score reorder).
    f32 = f_t.astype(jnp.float32)
    inv_fn = jax.lax.rsqrt(jnp.sum(f32 * f32, axis=1, keepdims=True) + 1e-8)  # [B,1,HW]
    if HWp != HW:
        inv_fn = jnp.pad(inv_fn, ((0, 0), (0, 0), (0, HWp - HW)))

    # Per-(batch, n_tile, hw_tile) window-hit flags (scalar prefetch -> SMEM).
    if windowed:
        gx_t = gx.reshape(num_t, T)
        gy_t = gy.reshape(num_t, T)
        v_t = valid.reshape(num_t, T) > 0.5
        big = jnp.float32(1e30)
        tx_min = jnp.min(jnp.where(v_t, gx_t, big), axis=1)
        tx_max = jnp.max(jnp.where(v_t, gx_t, -big), axis=1)
        ty_min = jnp.min(jnp.where(v_t, gy_t, big), axis=1)
        ty_max = jnp.max(jnp.where(v_t, gy_t, -big), axis=1)
        cx = ctr_p[..., 0].reshape(B, n_tiles, TN)[..., None]    # (B, nt, TN, 1)
        cy = ctr_p[..., 1].reshape(B, n_tiles, TN)[..., None]
        hit = ((cx >= tx_min - win) & (cx <= tx_max + win) &
               (cy >= ty_min - win) & (cy <= ty_max + win))      # (B, nt, TN, num_t)
        hit = jnp.any(hit, axis=2)                               # (B, nt, num_t)
    else:
        hit = jnp.ones((B, n_tiles, num_t), bool)
    hit_flags = hit.reshape(B * n_tiles, num_t).astype(jnp.int32)

    # DMA-skip fetch index: last hit tile <= t (else next hit > t, else 0).  Skipped
    # tiles return the previously fetched block index -> no new HBM DMA for them.
    tt = jnp.arange(num_t, dtype=jnp.int32)[None, :]
    last_hit = jax.lax.cummax(jnp.where(hit_flags > 0, tt, -1), axis=1)
    next_hit = jax.lax.cummin(jnp.where(hit_flags > 0, tt, num_t), axis=1, reverse=True)
    fetch_idx = jnp.where(last_hit >= 0, last_hit,
                          jnp.where(next_hit < num_t, next_hit, 0)).astype(jnp.int32)

    f_pad = f_t.astype(jnp.bfloat16)
    if HWp != HW:
        f_pad = jnp.pad(f_pad, ((0, 0), (0, 0), (0, HWp - HW)))

    kern = functools.partial(_corr_expect_kernel, win=float(win), windowed=windowed,
                             n_tiles=n_tiles)
    grid_spec = pltpu.PrefetchScalarGridSpec(
        num_scalar_prefetch=2,
        grid=(B, n_tiles, num_t),
        in_specs=[
            pl.BlockSpec((1, TN, C), lambda b, n, t, hit, fidx: (b, n, 0)),
            pl.BlockSpec((1, C, T),
                         lambda b, n, t, hit, fidx: (b, 0, fidx[b * n_tiles + n, t])),
            pl.BlockSpec((1, 1, T),
                         lambda b, n, t, hit, fidx: (b, 0, fidx[b * n_tiles + n, t])),
            pl.BlockSpec((1, 3, T),
                         lambda b, n, t, hit, fidx: (0, 0, fidx[b * n_tiles + n, t])),
            pl.BlockSpec((1, TN, 2), lambda b, n, t, hit, fidx: (b, n, 0)),
        ],
        out_specs=pl.BlockSpec((1, TN, 2), lambda b, n, t, hit, fidx: (b, n, 0)),
        scratch_shapes=[pltpu.VMEM((TN, 1), jnp.float32) for _ in range(4)],
    )
    out = pl.pallas_call(
        kern,
        out_shape=jax.ShapeDtypeStruct((B, Np, 2), jnp.float32),
        grid_spec=grid_spec,
        compiler_params=pltpu.CompilerParams(
            dimension_semantics=("parallel", "parallel", "arbitrary"),
            vmem_limit_bytes=_VMEM_LIMIT),
    )(hit_flags, fetch_idx, qn, f_pad, inv_fn, grid_arr, ctr_p)
    return out[:, :N]


# ----------------------------------------------------------------------------
# CAPSNet-style coarse-to-fine matcher (glue around the Pallas kernels)
# ----------------------------------------------------------------------------
def init_params(key, cin=3, c1=32, coarse_feat_dim=128, fine_feat_dim=128):
    k1, k2, k3 = jax.random.split(key, 3)

    def lin(k, fan_in, fan_out):
        return jax.random.normal(k, (fan_in, fan_out), jnp.float32) / jnp.sqrt(fan_in)

    return dict(
        w1=lin(k1, cin * 9, c1), b1=jnp.zeros((c1,), jnp.float32),
        wc=lin(k2, c1 * 9, coarse_feat_dim), bc=jnp.zeros((coarse_feat_dim,), jnp.float32),
        wf=lin(k3, c1 * 9, fine_feat_dim), bf=jnp.zeros((fine_feat_dim,), jnp.float32),
    )


def _sample_desc(feat, xy, *, Wf, Hf, stride, offset):
    """Nearest-neighbor descriptor sampling. feat: [B, HW, C], xy: [B, N, 2] pixel coords."""
    ix = jnp.clip(jnp.round((xy[..., 0] - offset) / stride), 0, Wf - 1).astype(jnp.int32)
    iy = jnp.clip(jnp.round((xy[..., 1] - offset) / stride), 0, Hf - 1).astype(jnp.int32)
    flat = iy * Wf + ix                                          # [B, N]
    return jnp.take_along_axis(feat, flat[:, :, None], axis=1)   # [B, N, C]


def capsnet_forward(params, img_r, img_n, xy_r, *, window_size=0.125):
    B, _, H, W = img_r.shape

    # Batch both images through the backbone once (weights DMA'd once per layer).
    # ImageNet normalization is folded into conv1 (exact, incl. padding semantics).
    imgs = jnp.concatenate([img_r, img_n], axis=0)                                   # [2B,3,H,W]
    w1f, b1f, mean = _fold_imagenet_norm(params["w1"], params["b1"])
    f1 = conv2d_pallas(imgs, w1f, b1f, k=3, stride=2, pad=1, relu=True, pad_value=mean)
    f1_nchw = jnp.transpose(f1, (0, 3, 1, 2))
    fc = conv2d_pallas(f1_nchw, params["wc"], params["bc"], k=3, stride=2, pad=1)    # coarse
    ff = conv2d_pallas(f1_nchw, params["wf"], params["bf"], k=3, stride=1, pad=1)    # fine
    Hc, Wc = fc.shape[1], fc.shape[2]
    Hf, Wfd = ff.shape[1], ff.shape[2]
    fc = fc.reshape(2 * B, Hc * Wc, -1)
    ff = ff.reshape(2 * B, Hf * Wfd, -1)
    fc_r, fc_n = fc[:B], fc[B:]
    ff_r, ff_n = ff[:B], ff[B:]

    sc, sf = H // Hc, H // Hf                  # coarse / fine strides w.r.t. the image
    off_c, off_f = (sc - 1) / 2.0, (sf - 1) / 2.0

    # Pre-transpose target features once (channels on sublanes, HW on lanes).
    fc_n_t = jnp.transpose(fc_n, (0, 2, 1))    # [B, C, HWc] bf16
    ff_n_t = jnp.transpose(ff_n, (0, 2, 1))    # [B, C, HWf] bf16

    # coarse level: global correlation, expected coordinate
    q_c = _sample_desc(fc_r, xy_r, Wf=Wc, Hf=Hc, stride=sc, offset=off_c)
    zero_ctr = jnp.zeros((B, xy_r.shape[1], 2), jnp.float32)
    coord2_ec = correlate_expect(q_c, fc_n_t, zero_ctr, Wf=Wc, stride=sc, offset=off_c,
                                 win=1e9, windowed=False)

    # fine level: correlation restricted to a window around the coarse prediction
    q_f = _sample_desc(ff_r, xy_r, Wf=Wfd, Hf=Hf, stride=sf, offset=off_f)
    win_px = window_size * W
    coord2_ef = correlate_expect(q_f, ff_n_t, coord2_ec, Wf=Wfd, stride=sf, offset=off_f,
                                 win=win_px, windowed=True)

    return {"coord2_ec": coord2_ec, "coord2_ef": coord2_ef}


def caps_forward(params, xy_r, n_r, img_r, img_n, apply_mask=True, ransac_tol=-1.0):
    """Mirrors CAPS.forward with ransac_tol = -1 (default)."""
    del n_r  # only used by the RANSAC branch (ransac_tol > 0), see TODO(synk) above
    # ImageNet normalize(img) is folded into the first conv inside capsnet_forward.
    aux_info = capsnet_forward(params, img_r, img_n, xy_r)
    xy_n_matched = aux_info["coord2_ef"]
    n_corr = xy_n_matched.shape[1]
    match_idx = jnp.tile(jnp.arange(n_corr, dtype=jnp.int32)[:, None], (1, 2))  # [n_corr, 2]
    B = xy_r.shape[0]
    if apply_mask:
        # ransac_tol <= 0  =>  mask is all ones  =>  full index list per batch item
        match_indices = [match_idx for _ in range(B)]
        aux_seq = [{k: v[i] for k, v in aux_info.items()} for i in range(B)]  # dictseq2seqdict
        return match_indices, xy_n_matched, aux_seq
    else:
        match_indices = [match_idx for _ in range(B)]
        match_masks = [jnp.ones((n_corr,), dtype=bool) for _ in range(B)]
        return match_indices, match_masks, (xy_n_matched, aux_info)


# ----------------------------------------------------------------------------
if __name__ == "__main__":
    key = jax.random.PRNGKey(0)
    kp, ki1, ki2, kxy = jax.random.split(key, 4)

    B, Cimg, H, W, N = 2, 3, 16, 16, 8
    img_r = jax.random.uniform(ki1, (B, Cimg, H, W), jnp.float32)          # NCHW in [0,1]
    img_n = jax.random.uniform(ki2, (B, Cimg, H, W), jnp.float32)
    xy_r = jax.random.uniform(kxy, (B, N, 2), jnp.float32, minval=0.0, maxval=float(H - 1))
    n_r = jnp.full((B,), N, jnp.int32)

    params = init_params(kp)

    match_indices, xy_n_matched, aux_seq = caps_forward(params, xy_r, n_r, img_r, img_n)
    jax.block_until_ready(xy_n_matched)

    assert xy_n_matched.shape == (B, N, 2)
    assert len(match_indices) == B and match_indices[0].shape == (N, 2)
    assert len(aux_seq) == B and aux_seq[0]["coord2_ef"].shape == (N, 2)
    assert bool(jnp.all(jnp.isfinite(xy_n_matched)))

    print("KERNEL_OK")
</pallas_src>

<mosaic_0001>
module attributes {stable_mosaic.version = 11 : i64} {
  func.func @_matmul_bias_kernel(%arg0: i32, %arg1: memref<256x128xbf16, #tpu.memory_space<vmem>>, %arg2: memref<128x32xbf16, #tpu.memory_space<vmem>>, %arg3: memref<1x32xf32, #tpu.memory_space<vmem>>, %arg4: memref<256x32xbf16, #tpu.memory_space<vmem>>) attributes {dimension_semantics = [#tpu.dimension_semantics<parallel>], iteration_bounds = array<i64: 1>, scalar_prefetch = 0 : i64, scratch_operands = 0 : i64, tpu.core_type = #tpu.core_type<tc>, window_params = [{transform_indices = @transform_0, window_bounds = array<i64: 256, 128>}, {pipeline_mode = #tpu.pipeline_mode<synchronous>, transform_indices = @transform_1, window_bounds = array<i64: 128, 32>}, {pipeline_mode = #tpu.pipeline_mode<synchronous>, transform_indices = @transform_2, window_bounds = array<i64: 1, 32>}, {transform_indices = @transform_3, window_bounds = array<i64: 256, 32>}]} {
    %c0 = arith.constant 0 : index
    %c0_0 = arith.constant 0 : index
    %0 = vector.load %arg1[%c0, %c0_0] : memref<256x128xbf16, #tpu.memory_space<vmem>>, vector<256x128xbf16>
    %c0_1 = arith.constant 0 : index
    %c0_2 = arith.constant 0 : index
    %1 = vector.load %arg2[%c0_1, %c0_2] : memref<128x32xbf16, #tpu.memory_space<vmem>>, vector<128x32xbf16>
    %cst = arith.constant dense<0.000000e+00> : vector<256x32xf32>
    %2 = tpu.matmul %0, %1, %cst {dimension_numbers = #tpu.dot_dimension_numbers<[1], [0], [0], [1], [0, 0, 1, 1], [], []>} : vector<256x128xbf16>, vector<128x32xbf16>, vector<256x32xf32> -> vector<256x32xf32>
    %c0_3 = arith.constant 0 : index
    %c0_4 = arith.constant 0 : index
    %3 = vector.load %arg3[%c0_3, %c0_4] : memref<1x32xf32, #tpu.memory_space<vmem>>, vector<1x32xf32>
    %4 = vector.broadcast %3 : vector<1x32xf32> to vector<256x32xf32>
    %5 = arith.addf %2, %4 : vector<256x32xf32>
    %cst_5 = arith.constant 0.000000e+00 : f32
    %6 = vector.broadcast %cst_5 : f32 to vector<256x32xf32>
    %7 = arith.maximumf %5, %6 : vector<256x32xf32>
    %8 = arith.truncf %7 : vector<256x32xf32> to vector<256x32xbf16>
    %c0_6 = arith.constant 0 : index
    %c0_7 = arith.constant 0 : index
    %9 = vector.load %arg4[%c0_6, %c0_7] : memref<256x32xbf16, #tpu.memory_space<vmem>>, vector<256x32xbf16>
    tpu.vector_store %arg4[%c0_6, %c0_7], %8 {strides = array<i32>} : memref<256x32xbf16, #tpu.memory_space<vmem>>, vector<256x32xbf16>,
    return
  }
  func.func @transform_0(%arg0: i32) -> (i32, i32) {
    %c0_i32 = arith.constant 0 : i32
    %c0_i32_0 = arith.constant 0 : i32
    return %arg0, %c0_i32 : i32, i32
  }
  func.func @transform_1(%arg0: i32) -> (i32, i32) {
    %c0_i32 = arith.constant 0 : i32
    %c0_i32_0 = arith.constant 0 : i32
    %c0_i32_1 = arith.constant 0 : i32
    return %c0_i32, %c0_i32_0 : i32, i32
  }
  func.func @transform_2(%arg0: i32) -> (i32, i32) {
    %c0_i32 = arith.constant 0 : i32
    %c0_i32_0 = arith.constant 0 : i32
    %c0_i32_1 = arith.constant 0 : i32
    return %c0_i32, %c0_i32_0 : i32, i32
  }
  func.func @transform_3(%arg0: i32) -> (i32, i32) {
    %c0_i32 = arith.constant 0 : i32
    %c0_i32_0 = arith.constant 0 : i32
    return %arg0, %c0_i32 : i32, i32
  }
}

</mosaic_0001>

<bundles_post_ra>
// kernel: tpu_custom_call.1
= control target key start
LH: loop header
LB: loop body
LE: loop exit
PB: predicated region body
PF: predicated region fallthrough
CT: control target
= control target key end

     0   :  { %8 = vsyncpa [#allocation3], 0  ;;  %s815_s12 = smov [#allocation2]   ;;  %s1039_s0 = inlined_call_operand.hbm [shape: bf16[256,128], index: 0, kind: input, shape index: {}]   ;;  %s1040_s1 = inlined_call_operand.vmem [shape: bf16[128,32], index: 1, kind: input, shape index: {}]   ;;  %s1041_s2 = inlined_call_operand.vmem [shape: f32[1,32], index: 2, kind: input, shape index: {}]   ;;  %s1042_s3 = inlined_call_operand.vmem [shape: bf16[256,32], index: 3, kind: output, shape index: {}]  }
   0x1   :  { %s14_s13 = sshll.u32 %s815_s12, 4  ;;  %s791_s16 = scalar_lea.hbm %s1039_s0, 2048  ;;  %s15_s13 = int_to_ptr.vmem [resolvable:$true] %s14_s13 }
   0x2   :  { %p792_p0 = scmp.ne.s32.totalorder %s1039_s0, %s791_s16  ;;  %p795_p1 = scmp.lt.u32.totalorder %s791_s16, %s1039_s0 }
   0x4   :  { %p797_p2 = pnand %p795_p1, %p792_p0 }
   0x6   :  { %800 = shalt.err (!%p797_p2)
}
   0x7   :  { %s801_s21 = scalar_lea.vmem %s15_s13, 2048  ;;  %p806_p4 = scmp.lt.s32.totalorder %s15_s13, %s15_s13 }
   0x8   :  { %p802_p3 = scmp.ne.s32.totalorder %s15_s13, %s801_s21  ;;  %p807_p5 = scmp.lt.s32.totalorder %s801_s21, %s801_s21 }
   0xa   :  { %p808_p6 = por %p807_p5, %p806_p4 }
   0xc   :  { %p809_p7 = pnand %p808_p6, %p802_p3 }
   0xe   :  { %812 = shalt.err (!%p809_p7)
}
   0xf   :  { %s816_s22 = smov 64   ;;  %s817_s23 = smov 4  }
  0x10   :  { %20 = dma.hbm_to_vmem [thread:$0]  %s1039_s0, 2048, %s15_s13, [#allocation3], %s816_s22, %s816_s22, %s817_s23  }
  0x11   :  { %813 = dma.done.wait [#allocation3], 2048  }
  0x12   :  { %814 = vsyncadd [#allocation3], 4294965248  ;;  %v767_v0 = vld [vmem:[%s1040_s1] sm:$0xff]   ;;  %v768_v1 = vld [vmem:[%s1040_s1 + $0x8] sm:$0xff]   ;;  %vm549_vm0 = vcmask 257024  }
  0x13   :  { %700 = vmatprep.subr.bf16.mxu0 %v767_v0  ;;  %748 = vmatprep.subr.bf16.mxu1 %v767_v0  ;;  %v769_v2 = vld [vmem:[%s1040_s1 + $0x10] sm:$0xff]   ;;  %v770_v3 = vld [vmem:[%s1040_s1 + $0x18] sm:$0xff]   ;;  %v775_v4 = vld [vmem:[#allocation2] sm:$0xff]  }
  0x14   :  { %701 = vmatpush3.bf16.msra.mxu0 %v767_v0  ;;  %756 = vmatpush3.bf16.msra.mxu1 %v767_v0  ;;  %v776_v5 = vld [vmem:[#allocation2 + $0x40] sm:$0xff]   ;;  %v772_v7 = vld [vmem:[%s1040_s1 + $0x28] sm:$0xff]   ;;  %v773_v8 = vld [vmem:[%s1040_s1 + $0x30] sm:$0xff]  }
  0x15   :  { %702 = vmatprep.subr.bf16.mxu0 %v768_v1  ;;  %749 = vmatprep.subr.bf16.mxu1 %v768_v1  ;;  %v771_v6 = vld [vmem:[%s1040_s1 + $0x20] sm:$0xff]   ;;  %v774_v9 = vld [vmem:[%s1040_s1 + $0x38] sm:$0xff]   ;;  %v777_v10 = vld [vmem:[#allocation2 + $0x8] sm:$0xff]  }
  0x16   :  { %716 = vmatprep.mubr.bf16.mxu0 %v775_v4  ;;  %732 = vmatprep.mubr.bf16.mxu1 %v776_v5  ;;  %v778_v11 = vld [vmem:[#allocation2 + $0x48] sm:$0xff]   ;;  %v779_v12 = vld [vmem:[#allocation2 + $0x10] sm:$0xff]   ;;  %v781_v14 = vld [vmem:[#allocation2 + $0x18] sm:$0xff]  }
  0x17   :  { %v780_v13 = vld [vmem:[#allocation2 + $0x50] sm:$0xff]   ;;  %v782_v15 = vld [vmem:[#allocation2 + $0x58] sm:$0xff]   ;;  %v783_v16 = vld [vmem:[#allocation2 + $0x20] sm:$0xff]  }
  0x18   :  { %703 = vmatpush3.bf16.msra.mxu0 %v768_v1  ;;  %757 = vmatpush3.bf16.msra.mxu1 %v768_v1  ;;  %v784_v17 = vld [vmem:[#allocation2 + $0x60] sm:$0xff]   ;;  %v785_v18 = vld [vmem:[#allocation2 + $0x28] sm:$0xff]   ;;  %v787_v20 = vld [vmem:[#allocation2 + $0x30] sm:$0xff]  }
  0x19   :  { %704 = vmatprep.subr.bf16.mxu0 %v769_v2  ;;  %750 = vmatprep.subr.bf16.mxu1 %v769_v2  ;;  %v786_v19 = vld [vmem:[#allocation2 + $0x68] sm:$0xff]   ;;  %v788_v21 = vld [vmem:[#allocation2 + $0x70] sm:$0xff]   ;;  %v789_v22 = vld [vmem:[#allocation2 + $0x38] sm:$0xff]  }
  0x1a   :  { %v790_v23 = vld [vmem:[#allocation2 + $0x78] sm:$0xff]   ;;  %v877_v24 = vld [vmem:[%s1041_s2] ss:$0 sm:$0xff] }
  0x1c   :  { %705 = vmatpush3.bf16.msra.mxu0 %v769_v2  ;;  %758 = vmatpush3.bf16.msra.mxu1 %v769_v2 }
  0x1d   :  { %706 = vmatprep.subr.bf16.mxu0 %v770_v3  ;;  %751 = vmatprep.subr.bf16.mxu1 %v770_v3 }
  0x20   :  { %707 = vmatpush3.bf16.msra.mxu0 %v770_v3  ;;  %759 = vmatpush3.bf16.msra.mxu1 %v770_v3 }
  0x21   :  { %708 = vmatprep.subr.bf16.mxu0 %v771_v6  ;;  %752 = vmatprep.subr.bf16.mxu1 %v771_v6 }
  0x24   :  { %709 = vmatpush3.bf16.msra.mxu0 %v771_v6  ;;  %760 = vmatpush3.bf16.msra.mxu1 %v771_v6 }
  0x25   :  { %710 = vmatprep.subr.bf16.mxu0 %v772_v7  ;;  %753 = vmatprep.subr.bf16.mxu1 %v772_v7 }
  0x28   :  { %711 = vmatpush3.bf16.msra.mxu0 %v772_v7  ;;  %761 = vmatpush3.bf16.msra.mxu1 %v772_v7 }
  0x29   :  { %712 = vmatprep.subr.bf16.mxu0 %v773_v8  ;;  %754 = vmatprep.subr.bf16.mxu1 %v773_v8 }
  0x2c   :  { %713 = vmatpush3.bf16.msra.mxu0 %v773_v8  ;;  %762 = vmatpush3.bf16.msra.mxu1 %v773_v8 }
  0x2d   :  { %714 = vmatprep.subr.bf16.mxu0 %v774_v9  ;;  %755 = vmatprep.subr.bf16.mxu1 %v774_v9 }
  0x30   :  { %715 = vmatpush3.bf16.msra.mxu0 %v774_v9  ;;  %763 = vmatpush3.bf16.msra.mxu1 %v774_v9 }
  0x33   :  { %717 = vmatmul.mubr.bf16.vlgmr.msra.gmra.mrb[0].mxu0 %v777_v10  ;;  %733 = vmatmul.mubr.bf16.vlgmr.msra.gmra.mrb[0].mxu1 %v778_v11 }
  0x34   :  { %720 = vmatprep.mubr.bf16.mxu0 %v779_v12  ;;  %736 = vmatprep.mubr.bf16.mxu1 %v780_v13 }
  0x3b   :  { %721 = vmatmul.mubr.bf16.gmra.mrb[4].mxu0 %v781_v14  ;;  %737 = vmatmul.mubr.bf16.gmra.mrb[4].mxu1 %v782_v15 }
  0x3c   :  { %724 = vmatprep.mubr.bf16.mxu0 %v783_v16  ;;  %740 = vmatprep.mubr.bf16.mxu1 %v784_v17 }
  0x43   :  { %725 = vmatmul.mubr.bf16.gmra.mrb[8].mxu0 %v785_v18  ;;  %741 = vmatmul.mubr.bf16.gmra.mrb[8].mxu1 %v786_v19 }
  0x44   :  { %728 = vmatprep.mubr.bf16.mxu0 %v787_v20  ;;  %744 = vmatprep.mubr.bf16.mxu1 %v788_v21 }
  0x4b   :  { %729 = vmatmul.mubr.bf16.gmra.mrb[12].mxu0 %v789_v22  ;;  %745 = vmatmul.mubr.bf16.gmra.mrb[12].mxu1 %v790_v23 }
 0x106   :  { %v718_v25 = vpop.f32.mrb[0].mxu0  ;;  %v734_v26 = vpop.f32.mrb[0].mxu1 }
 0x107   :  { %v271_v27 = vadd.f32 %v718_v25, %v877_v24  ;;  %v335_v28 = vadd.f32 %v734_v26, %v877_v24  ;;  %v262_v29 = vpop.f32.mrb[1].mxu0  ;;  %v326_v30 = vpop.f32.mrb[1].mxu1 }
 0x108   :  { %v263_v31 = vadd.f32 %v877_v24, %v262_v29  ;;  %v327_v32 = vadd.f32 %v877_v24, %v326_v30  ;;  %v719_v33 = vpop.f32.mrb[2].mxu0  ;;  %v735_v34 = vpop.f32.mrb[2].mxu1 }
 0x109   :  { %v391_v35 = vmax.f32 %v271_v27, 0.0  ;;  %v407_v36 = vmax.f32 %v335_v28, 0.0  ;;  %v274_v37 = vadd.f32 %v719_v33, %v877_v24  ;;  %v338_v38 = vadd.f32 %v735_v34, %v877_v24  ;;  %v265_v39 = vpop.f32.mrb[3].mxu0  ;;  %v329_v40 = vpop.f32.mrb[3].mxu1 }
 0x10a   :  { %v389_v41 = vmax.f32 %v263_v31, 0.0  ;;  %v405_v42 = vmax.f32 %v327_v32, 0.0  ;;  %v266_v43 = vadd.f32 %v877_v24, %v265_v39  ;;  %v330_v44 = vadd.f32 %v877_v24, %v329_v40 }
 0x10b   :  { %v646_v45 = vpack.c.bf16 %v391_v35, %v391_v35  ;;  %v662_v46 = vpack.c.bf16 %v407_v36, %v407_v36  ;;  %v392_v47 = vmax.f32 %v274_v37, 0.0  ;;  %v408_v48 = vmax.f32 %v338_v38, 0.0 }
 0x10c   :  { %v644_v49 = vpack.c.bf16 %v389_v41, %v389_v41  ;;  %v660_v50 = vpack.c.bf16 %v405_v42, %v405_v42  ;;  %v390_v51 = vmax.f32 %v266_v43, 0.0  ;;  %v406_v52 = vmax.f32 %v330_v44, 0.0 }
 0x10d   :  { %552 = vst.msk [vmem:[%s1042_s3 + $0x8] sm:$0xf] %vm549_vm0, %v646_v45  ;;  %568 = vst.msk [vmem:[%s1042_s3 + $0x48] sm:$0xf] %vm549_vm0, %v662_v46  ;;  %v647_v53 = vpack.c.bf16 %v392_v47, %v392_v47  ;;  %v663_v54 = vpack.c.bf16 %v408_v48, %v408_v48 }
 0x10e   :  { %550 = vst.msk [vmem:[%s1042_s3] sm:$0xf] %vm549_vm0, %v644_v49  ;;  %566 = vst.msk [vmem:[%s1042_s3 + $0x40] sm:$0xf] %vm549_vm0, %v660_v50  ;;  %v645_v55 = vpack.c.bf16 %v390_v51, %v390_v51  ;;  %v661_v56 = vpack.c.bf16 %v406_v52, %v406_v52  ;;  %v722_v57 = vpop.f32.mrb[4].mxu0  ;;  %v738_v58 = vpop.f32.mrb[4].mxu1 }
 0x10f   :  { %553 = vst.msk [vmem:[%s1042_s3 + $0xc] sm:$0xf] %vm549_vm0, %v647_v53  ;;  %569 = vst.msk [vmem:[%s1042_s3 + $0x4c] sm:$0xf] %vm549_vm0, %v663_v54  ;;  %v287_v59 = vadd.f32 %v722_v57, %v877_v24  ;;  %v351_v60 = vadd.f32 %v738_v58, %v877_v24  ;;  %v278_v61 = vpop.f32.mrb[5].mxu0  ;;  %v342_v62 = vpop.f32.mrb[5].mxu1 }
 0x110   :  { %551 = vst.msk [vmem:[%s1042_s3 + $0x4] sm:$0xf] %vm549_vm0, %v645_v55  ;;  %567 = vst.msk [vmem:[%s1042_s3 + $0x44] sm:$0xf] %vm549_vm0, %v661_v56  ;;  %v279_v63 = vadd.f32 %v877_v24, %v278_v61  ;;  %v343_v0 = vadd.f32 %v877_v24, %v342_v62  ;;  %v723_v1 = vpop.f32.mrb[6].mxu0  ;;  %v739_v2 = vpop.f32.mrb[6].mxu1 }
 0x111   :  { %v395_v3 = vmax.f32 %v287_v59, 0.0  ;;  %v411_v4 = vmax.f32 %v351_v60, 0.0  ;;  %v290_v5 = vadd.f32 %v723_v1, %v877_v24  ;;  %v354_v6 = vadd.f32 %v739_v2, %v877_v24  ;;  %v281_v7 = vpop.f32.mrb[7].mxu0  ;;  %v345_v8 = vpop.f32.mrb[7].mxu1 }
 0x112   :  { %v393_v9 = vmax.f32 %v279_v63, 0.0  ;;  %v409_v10 = vmax.f32 %v343_v0, 0.0  ;;  %v282_v11 = vadd.f32 %v877_v24, %v281_v7  ;;  %v346_v12 = vadd.f32 %v877_v24, %v345_v8 }
 0x113   :  { %v650_v13 = vpack.c.bf16 %v395_v3, %v395_v3  ;;  %v666_v14 = vpack.c.bf16 %v411_v4, %v411_v4  ;;  %v396_v15 = vmax.f32 %v290_v5, 0.0  ;;  %v412_v16 = vmax.f32 %v354_v6, 0.0 }
 0x114   :  { %v648_v17 = vpack.c.bf16 %v393_v9, %v393_v9  ;;  %v664_v18 = vpack.c.bf16 %v409_v10, %v409_v10  ;;  %v394_v19 = vmax.f32 %v282_v11, 0.0  ;;  %v410_v20 = vmax.f32 %v346_v12, 0.0 }
 0x115   :  { %556 = vst.msk [vmem:[%s1042_s3 + $0x18] sm:$0xf] %vm549_vm0, %v650_v13  ;;  %572 = vst.msk [vmem:[%s1042_s3 + $0x58] sm:$0xf] %vm549_vm0, %v666_v14  ;;  %v651_v21 = vpack.c.bf16 %v396_v15, %v396_v15  ;;  %v667_v22 = vpack.c.bf16 %v412_v16, %v412_v16 }
 0x116   :  { %554 = vst.msk [vmem:[%s1042_s3 + $0x10] sm:$0xf] %vm549_vm0, %v648_v17  ;;  %570 = vst.msk [vmem:[%s1042_s3 + $0x50] sm:$0xf] %vm549_vm0, %v664_v18  ;;  %v649_v23 = vpack.c.bf16 %v394_v19, %v394_v19  ;;  %v665_v25 = vpack.c.bf16 %v410_v20, %v410_v20  ;;  %v726_v26 = vpop.f32.mrb[8].mxu0  ;;  %v742_v27 = vpop.f32.mrb[8].mxu1 }
 0x117   :  { %557 = vst.msk [vmem:[%s1042_s3 + $0x1c] sm:$0xf] %vm549_vm0, %v651_v21  ;;  %573 = vst.msk [vmem:[%s1042_s3 + $0x5c] sm:$0xf] %vm549_vm0, %v667_v22  ;;  %v303_v28 = vadd.f32 %v726_v26, %v877_v24  ;;  %v367_v29 = vadd.f32 %v742_v27, %v877_v24  ;;  %v294_v30 = vpop.f32.mrb[9].mxu0  ;;  %v358_v31 = vpop.f32.mrb[9].mxu1 }
 0x118   :  { %555 = vst.msk [vmem:[%s1042_s3 + $0x14] sm:$0xf] %vm549_vm0, %v649_v23  ;;  %571 = vst.msk [vmem:[%s1042_s3 + $0x54] sm:$0xf] %vm549_vm0, %v665_v25  ;;  %v295_v32 = vadd.f32 %v877_v24, %v294_v30  ;;  %v359_v33 = vadd.f32 %v877_v24, %v358_v31  ;;  %v727_v34 = vpop.f32.mrb[10].mxu0  ;;  %v743_v35 = vpop.f32.mrb[10].mxu1 }
 0x119   :  { %v399_v36 = vmax.f32 %v303_v28, 0.0  ;;  %v415_v37 = vmax.f32 %v367_v29, 0.0  ;;  %v306_v38 = vadd.f32 %v727_v34, %v877_v24  ;;  %v370_v39 = vadd.f32 %v743_v35, %v877_v24  ;;  %v297_v40 = vpop.f32.mrb[11].mxu0  ;;  %v361_v41 = vpop.f32.mrb[11].mxu1 }
 0x11a   :  { %v397_v42 = vmax.f32 %v295_v32, 0.0  ;;  %v413_v43 = vmax.f32 %v359_v33, 0.0  ;;  %v298_v44 = vadd.f32 %v877_v24, %v297_v40  ;;  %v362_v45 = vadd.f32 %v877_v24, %v361_v41 }
 0x11b   :  { %v654_v46 = vpack.c.bf16 %v399_v36, %v399_v36  ;;  %v670_v47 = vpack.c.bf16 %v415_v37, %v415_v37  ;;  %v400_v48 = vmax.f32 %v306_v38, 0.0  ;;  %v416_v49 = vmax.f32 %v370_v39, 0.0 }
 0x11c   :  { %v652_v50 = vpack.c.bf16 %v397_v42, %v397_v42  ;;  %v668_v51 = vpack.c.bf16 %v413_v43, %v413_v43  ;;  %v398_v52 = vmax.f32 %v298_v44, 0.0  ;;  %v414_v53 = vmax.f32 %v362_v45, 0.0 }
 0x11d   :  { %560 = vst.msk [vmem:[%s1042_s3 + $0x28] sm:$0xf] %vm549_vm0, %v654_v46  ;;  %576 = vst.msk [vmem:[%s1042_s3 + $0x68] sm:$0xf] %vm549_vm0, %v670_v47  ;;  %v655_v54 = vpack.c.bf16 %v400_v48, %v400_v48  ;;  %v671_v55 = vpack.c.bf16 %v416_v49, %v416_v49 }
 0x11e   :  { %558 = vst.msk [vmem:[%s1042_s3 + $0x20] sm:$0xf] %vm549_vm0, %v652_v50  ;;  %574 = vst.msk [vmem:[%s1042_s3 + $0x60] sm:$0xf] %vm549_vm0, %v668_v51  ;;  %v653_v56 = vpack.c.bf16 %v398_v52, %v398_v52  ;;  %v669_v57 = vpack.c.bf16 %v414_v53, %v414_v53  ;;  %v730_v58 = vpop.f32.mrb[12].mxu0  ;;  %v746_v59 = vpop.f32.mrb[12].mxu1 }
 0x11f   :  { %561 = vst.msk [vmem:[%s1042_s3 + $0x2c] sm:$0xf] %vm549_vm0, %v655_v54  ;;  %577 = vst.msk [vmem:[%s1042_s3 + $0x6c] sm:$0xf] %vm549_vm0, %v671_v55  ;;  %v319_v60 = vadd.f32 %v730_v58, %v877_v24  ;;  %v383_v61 = vadd.f32 %v746_v59, %v877_v24  ;;  %v310_v62 = vpop.f32.mrb[13].mxu0  ;;  %v374_v63 = vpop.f32.mrb[13].mxu1 }
 0x120   :  { %559 = vst.msk [vmem:[%s1042_s3 + $0x24] sm:$0xf] %vm549_vm0, %v653_v56  ;;  %575 = vst.msk [vmem:[%s1042_s3 + $0x64] sm:$0xf] %vm549_vm0, %v669_v57  ;;  %v311_v0 = vadd.f32 %v877_v24, %v310_v62  ;;  %v375_v1 = vadd.f32 %v877_v24, %v374_v63  ;;  %v731_v2 = vpop.f32.mrb[14].mxu0  ;;  %v747_v3 = vpop.f32.mrb[14].mxu1 }
 0x121   :  { %v403_v4 = vmax.f32 %v319_v60, 0.0  ;;  %v419_v5 = vmax.f32 %v383_v61, 0.0  ;;  %v322_v6 = vadd.f32 %v731_v2, %v877_v24  ;;  %v386_v7 = vadd.f32 %v747_v3, %v877_v24  ;;  %v313_v8 = vpop.f32.mrb[15].mxu0  ;;  %v377_v9 = vpop.f32.mrb[15].mxu1 }
 0x122   :  { %v401_v10 = vmax.f32 %v311_v0, 0.0  ;;  %v417_v11 = vmax.f32 %v375_v1, 0.0  ;;  %v314_v12 = vadd.f32 %v877_v24, %v313_v8  ;;  %v378_v13 = vadd.f32 %v877_v24, %v377_v9 }
 0x123   :  { %v658_v14 = vpack.c.bf16 %v403_v4, %v403_v4  ;;  %v674_v15 = vpack.c.bf16 %v419_v5, %v419_v5  ;;  %v404_v16 = vmax.f32 %v322_v6, 0.0  ;;  %v420_v17 = vmax.f32 %v386_v7, 0.0 }
 0x124   :  { %v656_v18 = vpack.c.bf16 %v401_v10, %v401_v10  ;;  %v672_v19 = vpack.c.bf16 %v417_v11, %v417_v11  ;;  %v402_v20 = vmax.f32 %v314_v12, 0.0  ;;  %v418_v21 = vmax.f32 %v378_v13, 0.0 }
 0x125   :  { %564 = vst.msk [vmem:[%s1042_s3 + $0x38] sm:$0xf] %vm549_vm0, %v658_v14  ;;  %580 = vst.msk [vmem:[%s1042_s3 + $0x78] sm:$0xf] %vm549_vm0, %v674_v15  ;;  %v659_v22 = vpack.c.bf16 %v404_v16, %v404_v16  ;;  %v675_v24 = vpack.c.bf16 %v420_v17, %v420_v17 }
 0x126   :  { %562 = vst.msk [vmem:[%s1042_s3 + $0x30] sm:$0xf] %vm549_vm0, %v656_v18  ;;  %578 = vst.msk [vmem:[%s1042_s3 + $0x70] sm:$0xf] %vm549_vm0, %v672_v19  ;;  %v657_v23 = vpack.c.bf16 %v402_v20, %v402_v20  ;;  %v673_v25 = vpack.c.bf16 %v418_v21, %v418_v21 }
 0x127   :  { %565 = vst.msk [vmem:[%s1042_s3 + $0x3c] sm:$0xf] %vm549_vm0, %v659_v22  ;;  %581 = vst.msk [vmem:[%s1042_s3 + $0x7c] sm:$0xf] %vm549_vm0, %v675_v24 }
 0x128   :  { %563 = vst.msk [vmem:[%s1042_s3 + $0x34] sm:$0xf] %vm549_vm0, %v657_v23  ;;  %579 = vst.msk [vmem:[%s1042_s3 + $0x74] sm:$0xf] %vm549_vm0, %v673_v25 }
 0x129   :  { %586 = vsyncpa [#allocation3], 1 }

</bundles_post_ra>
